<compile_context>
chip_gen: v7x
topology: tpu7x:2x2x1
jax: 0.10.0
libtpu: 0.0.40
codegen_flags: <defaults>
</compile_context>

<pallas_src>
import functools

import jax
import jax.numpy as jnp
from jax.experimental import pallas as pl
from jax.experimental.pallas import tpu as pltpu

N_QUBITS = 4
LANE = 128
SUBLANE = 8


def _round_up(n, m):
    return ((n + m - 1) // m) * m


def _cdiv(a, b):
    return (a + b - 1) // b


def _dqn_kernel(x_ref, w_ref, b_ref, out_ref, *, k_pad):
    """Fused 3-layer MLP on one (TILE_B, k_pad) batch tile.

    x_ref  : (TILE_B, k_pad) bf16  -- streamed batch tile (lane dim = state_dim, 8-padded)
    w_ref  : (3, D, D)       bf16  -- packed zero-padded weights (pinned VMEM block)
    b_ref  : (3, 1, D)       f32   -- packed zero-padded biases  (pinned VMEM block)
    out_ref: (TILE_B, D)     f32   -- lane-dense output tile
    """
    # fc1 + relu (only the first k_pad weight rows can be non-zero).
    h = jnp.dot(x_ref[...], w_ref[0, :k_pad, :], preferred_element_type=jnp.float32)
    h = jnp.maximum(h + b_ref[0], 0.0)
    # fc2 + relu
    h = jnp.dot(h.astype(jnp.bfloat16), w_ref[1], preferred_element_type=jnp.float32)
    h = jnp.maximum(h + b_ref[1], 0.0)
    # fc3 (no activation)
    q = jnp.dot(h.astype(jnp.bfloat16), w_ref[2], preferred_element_type=jnp.float32)
    out_ref[...] = (q + b_ref[2]).astype(out_ref.dtype)


def init_params(key, state_dim, n_actions, num_quantiles):
    """Deterministic synthetic parameters (shapes match the PyTorch module),
    stored (in_features, out_features) so the kernel computes x @ W + b."""
    k1, k2, k3, k4, k5, k6 = jax.random.split(key, 6)
    out_dim = n_actions * num_quantiles
    w1 = jax.random.normal(k1, (state_dim, 64), jnp.float32) * 0.1
    b1 = jax.random.normal(k2, (1, 64), jnp.float32) * 0.1
    w2 = jax.random.normal(k3, (64, N_QUBITS), jnp.float32) * 0.1
    b2 = jax.random.normal(k4, (1, N_QUBITS), jnp.float32) * 0.1
    w3 = jax.random.normal(k5, (N_QUBITS, out_dim), jnp.float32) * 0.1
    b3 = jax.random.normal(k6, (1, out_dim), jnp.float32) * 0.1
    return (w1, b1, w2, b2, w3, b3)


def pack_params(params, state_dim, n_actions, num_quantiles):
    """Zero-pad every layer to a common lane-aligned width D and pack the three
    weight matrices / biases into single stacked arrays (one DMA each).
    Weights are stored bf16 (MXU-native on all generations); biases stay f32."""
    w1, b1, w2, b2, w3, b3 = params
    out_dim = n_actions * num_quantiles
    D = max(_round_up(d, LANE) for d in (state_dim, 64, N_QUBITS, out_dim))

    def pad_w(w):
        return jnp.zeros((D, D), jnp.bfloat16).at[: w.shape[0], : w.shape[1]].set(
            w.astype(jnp.bfloat16))

    def pad_b(b):
        b = b.reshape(1, -1)
        return jnp.zeros((1, D), jnp.float32).at[:, : b.shape[1]].set(b)

    W = jnp.stack([pad_w(w1), pad_w(w2), pad_w(w3)])   # (3, D, D) bf16
    B = jnp.stack([pad_b(b1), pad_b(b2), pad_b(b3)])   # (3, 1, D) f32
    return W, B, D, out_dim


def _choose_batch_tiling(B):
    """Pick (tile_b, b_pad): large tiles to amortize ~0.35us/grid-step, minimal
    batch over-padding (<=8 rows per tile), and >=2 (even) grid steps once the
    batch is big enough so v7x's two TensorCores both get work."""
    b8 = _round_up(max(B, 1), SUBLANE)
    target = 1024                       # rows per tile
    n_tiles = _cdiv(b8, target)
    if n_tiles == 1 and b8 >= 256:
        n_tiles = 2                     # split work across v7x's two TCs
    elif n_tiles > 1 and n_tiles % 2:
        n_tiles += 1                    # prefer an even number of grid steps
    tile_b = _round_up(_cdiv(b8, n_tiles), SUBLANE)
    b_pad = tile_b * n_tiles
    return tile_b, b_pad


def dqn_forward(x, packed, n_actions, num_quantiles):
    """x: (B, state_dim) float32.  Returns (B, n_actions, num_quantiles) float32."""
    W, Bv, D, out_dim = packed
    B, state_dim = x.shape
    k_pad = _round_up(state_dim, SUBLANE)
    tile_b, b_pad = _choose_batch_tiling(B)

    # Keep x narrow (no 128-lane padding).  Pad/cast only when necessary.
    if b_pad == B and k_pad == state_dim:
        x_p = x.astype(jnp.bfloat16)
    else:
        x_p = jnp.zeros((b_pad, k_pad), jnp.bfloat16).at[:B, :state_dim].set(
            x.astype(jnp.bfloat16))

    flops = 2 * b_pad * D * (k_pad + 2 * D)
    bytes_accessed = (2 * b_pad * k_pad      # bf16 input stream
                      + 4 * b_pad * D        # f32 output writeback
                      + 2 * 3 * D * D        # bf16 packed weights (once)
                      + 4 * 3 * D)           # f32 packed biases (once)

    kernel = functools.partial(_dqn_kernel, k_pad=k_pad)

    q_pad = pl.pallas_call(
        kernel,
        out_shape=jax.ShapeDtypeStruct((b_pad, D), jnp.float32),
        grid_spec=pltpu.PrefetchScalarGridSpec(
            num_scalar_prefetch=0,
            grid=(b_pad // tile_b,),
            in_specs=[
                pl.BlockSpec((tile_b, k_pad), lambda i: (i, 0)),   # batch stream
                pl.BlockSpec((3, D, D), lambda i: (0, 0, 0)),      # packed weights (pinned)
                pl.BlockSpec((3, 1, D), lambda i: (0, 0, 0)),      # packed biases (pinned)
            ],
            out_specs=pl.BlockSpec((tile_b, D), lambda i: (i, 0)),
        ),
        compiler_params=pltpu.CompilerParams(
            dimension_semantics=("parallel",),       # batch tiles shard across TCs on v7x
            vmem_limit_bytes=32 * 1024 * 1024,
        ),
        cost_estimate=pl.CostEstimate(
            flops=flops, transcendentals=0, bytes_accessed=bytes_accessed),
    )(x_p, W, Bv)

    # Slice off padding, then match torch: q_values.view(-1, n_actions, num_quantiles)
    return q_pad[:B, :out_dim].reshape(-1, n_actions, num_quantiles)


if __name__ == "__main__":
    key = jax.random.PRNGKey(0)
    kx, kp = jax.random.split(key)

    # Small shapes consistent with the module's forward.
    batch = 8
    state_dim = 32
    n_actions = 4
    num_quantiles = 8

    x = jax.random.normal(kx, (batch, state_dim), jnp.float32)
    params = init_params(kp, state_dim, n_actions, num_quantiles)
    packed = pack_params(params, state_dim, n_actions, num_quantiles)

    q = dqn_forward(x, packed, n_actions, num_quantiles)
    q = jax.block_until_ready(q)

    # Pure-JAX f32 reference.  Kernel matmuls are bf16 (f32 accumulate), so the
    # tolerance is loosened accordingly.
    w1, b1, w2, b2, w3, b3 = params
    h = jnp.maximum(x @ w1 + b1, 0.0)
    h = jnp.maximum(h @ w2 + b2, 0.0)
    ref = (h @ w3 + b3).reshape(-1, n_actions, num_quantiles)
    assert q.shape == (batch, n_actions, num_quantiles), q.shape
    assert jnp.allclose(q, ref, atol=2e-2, rtol=2e-2), "mismatch vs reference"

    print("KERNEL_OK")
</pallas_src>

<mosaic_0001>
module attributes {stable_mosaic.version = 11 : i64} {
  func.func @_dqn_kernel(%arg0: i32, %arg1: memref<8x32xbf16, #tpu.memory_space<vmem>>, %arg2: memref<3x128x128xbf16, #tpu.memory_space<vmem>>, %arg3: memref<3x1x128xf32, #tpu.memory_space<vmem>>, %arg4: memref<8x128xf32, #tpu.memory_space<vmem>>) attributes {dimension_semantics = [#tpu.dimension_semantics<parallel>], iteration_bounds = array<i64: 1>, scalar_prefetch = 0 : i64, scratch_operands = 0 : i64, tpu.core_type = #tpu.core_type<tc>, window_params = [{transform_indices = @transform_0, window_bounds = array<i64: 8, 32>}, {pipeline_mode = #tpu.pipeline_mode<synchronous>, transform_indices = @transform_1, window_bounds = array<i64: 3, 128, 128>}, {pipeline_mode = #tpu.pipeline_mode<synchronous>, transform_indices = @transform_2, window_bounds = array<i64: 3, 1, 128>}, {transform_indices = @transform_3, window_bounds = array<i64: 8, 128>}]} {
    %c0 = arith.constant 0 : index
    %c0_0 = arith.constant 0 : index
    %0 = vector.load %arg1[%c0, %c0_0] : memref<8x32xbf16, #tpu.memory_space<vmem>>, vector<8x32xbf16>
    %c0_1 = arith.constant 0 : index
    %c0_2 = arith.constant 0 : index
    %c0_3 = arith.constant 0 : index
    %1 = vector.load %arg2[%c0_1, %c0_2, %c0_3] : memref<3x128x128xbf16, #tpu.memory_space<vmem>>, vector<1x32x128xbf16>
    %2 = vector.shape_cast %1 : vector<1x32x128xbf16> to vector<32x128xbf16>
    %cst = arith.constant dense<0.000000e+00> : vector<8x128xf32>
    %3 = tpu.matmul %0, %2, %cst {dimension_numbers = #tpu.dot_dimension_numbers<[1], [0], [0], [1], [0, 0, 1, 1], [], []>} : vector<8x32xbf16>, vector<32x128xbf16>, vector<8x128xf32> -> vector<8x128xf32>
    %c0_4 = arith.constant 0 : index
    %c0_5 = arith.constant 0 : index
    %c0_6 = arith.constant 0 : index
    %4 = vector.load %arg3[%c0_4, %c0_5, %c0_6] : memref<3x1x128xf32, #tpu.memory_space<vmem>>, vector<1x1x128xf32>
    %5 = vector.shape_cast %4 : vector<1x1x128xf32> to vector<1x128xf32>
    %6 = vector.broadcast %5 : vector<1x128xf32> to vector<8x128xf32>
    %7 = arith.addf %3, %6 : vector<8x128xf32>
    %cst_7 = arith.constant 0.000000e+00 : f32
    %8 = vector.broadcast %cst_7 : f32 to vector<8x128xf32>
    %9 = arith.maximumf %7, %8 : vector<8x128xf32>
    %10 = arith.truncf %9 : vector<8x128xf32> to vector<8x128xbf16>
    %c1 = arith.constant 1 : index
    %c0_8 = arith.constant 0 : index
    %c0_9 = arith.constant 0 : index
    %11 = vector.load %arg2[%c1, %c0_8, %c0_9] : memref<3x128x128xbf16, #tpu.memory_space<vmem>>, vector<1x128x128xbf16>
    %12 = vector.shape_cast %11 : vector<1x128x128xbf16> to vector<128x128xbf16>
    %cst_10 = arith.constant dense<0.000000e+00> : vector<8x128xf32>
    %13 = tpu.matmul %10, %12, %cst_10 {dimension_numbers = #tpu.dot_dimension_numbers<[1], [0], [0], [1], [0, 0, 1, 1], [], []>} : vector<8x128xbf16>, vector<128x128xbf16>, vector<8x128xf32> -> vector<8x128xf32>
    %c1_11 = arith.constant 1 : index
    %c0_12 = arith.constant 0 : index
    %c0_13 = arith.constant 0 : index
    %14 = vector.load %arg3[%c1_11, %c0_12, %c0_13] : memref<3x1x128xf32, #tpu.memory_space<vmem>>, vector<1x1x128xf32>
    %15 = vector.shape_cast %14 : vector<1x1x128xf32> to vector<1x128xf32>
    %16 = vector.broadcast %15 : vector<1x128xf32> to vector<8x128xf32>
    %17 = arith.addf %13, %16 : vector<8x128xf32>
    %cst_14 = arith.constant 0.000000e+00 : f32
    %18 = vector.broadcast %cst_14 : f32 to vector<8x128xf32>
    %19 = arith.maximumf %17, %18 : vector<8x128xf32>
    %20 = arith.truncf %19 : vector<8x128xf32> to vector<8x128xbf16>
    %c2 = arith.constant 2 : index
    %c0_15 = arith.constant 0 : index
    %c0_16 = arith.constant 0 : index
    %21 = vector.load %arg2[%c2, %c0_15, %c0_16] : memref<3x128x128xbf16, #tpu.memory_space<vmem>>, vector<1x128x128xbf16>
    %22 = vector.shape_cast %21 : vector<1x128x128xbf16> to vector<128x128xbf16>
    %cst_17 = arith.constant dense<0.000000e+00> : vector<8x128xf32>
    %23 = tpu.matmul %20, %22, %cst_17 {dimension_numbers = #tpu.dot_dimension_numbers<[1], [0], [0], [1], [0, 0, 1, 1], [], []>} : vector<8x128xbf16>, vector<128x128xbf16>, vector<8x128xf32> -> vector<8x128xf32>
    %c2_18 = arith.constant 2 : index
    %c0_19 = arith.constant 0 : index
    %c0_20 = arith.constant 0 : index
    %24 = vector.load %arg3[%c2_18, %c0_19, %c0_20] : memref<3x1x128xf32, #tpu.memory_space<vmem>>, vector<1x1x128xf32>
    %25 = vector.shape_cast %24 : vector<1x1x128xf32> to vector<1x128xf32>
    %26 = vector.broadcast %25 : vector<1x128xf32> to vector<8x128xf32>
    %27 = arith.addf %23, %26 : vector<8x128xf32>
    %c0_21 = arith.constant 0 : index
    %c0_22 = arith.constant 0 : index
    %28 = vector.load %arg4[%c0_21, %c0_22] : memref<8x128xf32, #tpu.memory_space<vmem>>, vector<8x128xf32>
    tpu.vector_store %arg4[%c0_21, %c0_22], %27 {strides = array<i32>} : memref<8x128xf32, #tpu.memory_space<vmem>>, vector<8x128xf32>,
    return
  }
  func.func @transform_0(%arg0: i32) -> (i32, i32) {
    %c0_i32 = arith.constant 0 : i32
    %c0_i32_0 = arith.constant 0 : i32
    return %arg0, %c0_i32 : i32, i32
  }
  func.func @transform_1(%arg0: i32) -> (i32, i32, i32) {
    %c0_i32 = arith.constant 0 : i32
    %c0_i32_0 = arith.constant 0 : i32
    %c0_i32_1 = arith.constant 0 : i32
    %c0_i32_2 = arith.constant 0 : i32
    return %c0_i32, %c0_i32_0, %c0_i32_1 : i32, i32, i32
  }
  func.func @transform_2(%arg0: i32) -> (i32, i32, i32) {
    %c0_i32 = arith.constant 0 : i32
    %c0_i32_0 = arith.constant 0 : i32
    %c0_i32_1 = arith.constant 0 : i32
    %c0_i32_2 = arith.constant 0 : i32
    return %c0_i32, %c0_i32_0, %c0_i32_1 : i32, i32, i32
  }
  func.func @transform_3(%arg0: i32) -> (i32, i32) {
    %c0_i32 = arith.constant 0 : i32
    %c0_i32_0 = arith.constant 0 : i32
    return %arg0, %c0_i32 : i32, i32
  }
}

</mosaic_0001>

<bundles_post_ra>
// kernel: tpu_custom_call.1
= control target key start
LH: loop header
LB: loop body
LE: loop exit
PB: predicated region body
PF: predicated region fallthrough
CT: control target
= control target key end

     0   :  { %8 = vsyncpa [#allocation3], 0  ;;  %s650_s0 = inlined_call_operand.hbm [shape: bf16[8,32], index: 0, kind: input, shape index: {}]   ;;  %s651_s1 = inlined_call_operand.hbm [shape: bf16[3,128,128], index: 1, kind: input, shape index: {}]   ;;  %s652_s2 = inlined_call_operand.vmem [shape: f32[3,1,128], index: 2, kind: input, shape index: {}]   ;;  %s653_s3 = inlined_call_operand.hbm [shape: f32[8,128], index: 3, kind: output, shape index: {}]  }
   0x1   :  { %9 = vsyncpa [#allocation6], 0 }
   0x2   :  { %10 = vsyncpa [#allocation4], 0  ;;  %s547_s12 = smov [#allocation2]   ;;  %s548_s14 = smov [#allocation5]  }
   0x3   :  { %s17_s13 = sshll.u32 %s547_s12, 4  ;;  %s26_s15 = sshll.u32 %s548_s14, 4  ;;  %s18_s13 = int_to_ptr.vmem [resolvable:$true] %s17_s13  ;;  %s574_s15 = int_to_ptr.vmem [resolvable:$true] %s26_s15 }
   0x4   :  { %s475_s18 = scalar_lea.hbm %s650_s0, 64 }
   0x5   :  { %p476_p0 = scmp.ne.s32.totalorder %s650_s0, %s475_s18  ;;  %p479_p1 = scmp.lt.u32.totalorder %s475_s18, %s650_s0 }
   0x7   :  { %p481_p2 = pnand %p479_p1, %p476_p0 }
   0x9   :  { %484 = shalt.err (!%p481_p2)
}
   0xa   :  { %s485_s23 = scalar_lea.vmem %s18_s13, 64  ;;  %p490_p4 = scmp.lt.s32.totalorder %s18_s13, %s18_s13 }
   0xb   :  { %p486_p3 = scmp.ne.s32.totalorder %s18_s13, %s485_s23  ;;  %p491_p5 = scmp.lt.s32.totalorder %s485_s23, %s485_s23 }
   0xd   :  { %p492_p6 = por %p491_p5, %p490_p4 }
   0xf   :  { %p493_p7 = pnand %p492_p6, %p486_p3 }
  0x11   :  { %496 = shalt.err (!%p493_p7)
}
  0x12   :  { %20 = dma.hbm_to_vmem [thread:$0]  %s650_s0, 64, %s18_s13, [#allocation3]  }
  0x13   :  { %s497_s28 = scalar_lea.hbm %s651_s1, 3072 }
  0x14   :  { %p498_p8 = scmp.ne.s32.totalorder %s651_s1, %s497_s28  ;;  %p501_p9 = scmp.lt.u32.totalorder %s497_s28, %s651_s1 }
  0x16   :  { %p503_p10 = pnand %p501_p9, %p498_p8 }
  0x18   :  { %506 = shalt.err (!%p503_p10)
}
  0x19   :  { %s507_s6 = scalar_lea.vmem %s574_s15, 3072  ;;  %p512_p12 = scmp.lt.s32.totalorder %s574_s15, %s574_s15 }
  0x1a   :  { %p508_p11 = scmp.ne.s32.totalorder %s574_s15, %s507_s6  ;;  %p513_p13 = scmp.lt.s32.totalorder %s507_s6, %s507_s6 }
  0x1c   :  { %p514_p0 = por %p513_p13, %p512_p12 }
  0x1e   :  { %p515_p1 = pnand %p514_p0, %p508_p11 }
  0x20   :  { %518 = shalt.err (!%p515_p1)
}
  0x21   :  { %s549_s0 = smov 64   ;;  %s550_s7 = smov 4  }
  0x22   :  { %32 = dma.hbm_to_vmem [thread:$0]  %s651_s1, 3072, %s574_s15, [#allocation6], %s549_s0, %s549_s0, %s550_s7  }
  0x23   :  { %541 = dma.done.wait [#allocation3], 64  }
  0x24   :  { %542 = vsyncadd [#allocation3], 4294967232 }
  0x25   :  { %543 = dma.done.wait [#allocation6], 3072  }
  0x26   :  { %544 = vsyncadd [#allocation6], 4294964224  ;;  %v551_v0 = vmov 0.0   ;;  %vm552_vm0 = vmmov 0   ;;  %v457_v1 = vld [vmem:[#allocation5] sm:$0xff]   ;;  %v458_v2 = vld [vmem:[#allocation5 + $0x8] sm:$0xff]  }
  0x27   :  { %402 = vmatprep.subr.bf16.mxu0 %v551_v0  ;;  %406 = vmatprep.mubr.msk.bf16.mxu0 %vm552_vm0, %v551_v0  ;;  %v459_v3 = vld [vmem:[#allocation5 + $0x40] sm:$0xff]   ;;  %vm66_vm1 = vcmask 261120   ;;  %v460_v4 = vld [vmem:[#allocation5 + $0x48] sm:$0xff]   ;;  %v42_v5 = vld [vmem:[#allocation2] sm:$0xf]  ;;  %s553_s15 = smov [#allocation7]  }
  0x28   :  { %410 = vmatprep.subr.bf16.mxu1 %v551_v0  ;;  %426 = vmatprep.mubr.msk.bf16.mxu1 %vm552_vm0, %v551_v0  ;;  %v461_v6 = vld [vmem:[#allocation5 + $0x50] sm:$0xff]   ;;  %v462_v7 = vld [vmem:[#allocation5 + $0x58] sm:$0xff]   ;;  %v463_v8 = vld [vmem:[#allocation5 + $0x60] sm:$0xff]   ;;  %s347_s16 = sshll.u32 %s553_s15, 4  ;;  %s348_s16 = int_to_ptr.vmem [resolvable:$true] %s347_s16 }
  0x29   :  { %403 = vmatpush3.bf16.msra.mxu0 %v457_v1  ;;  %411 = vmatpush3.bf16.msra.mxu1 %v459_v3  ;;  %v464_v9 = vld [vmem:[#allocation5 + $0x68] sm:$0xff]   ;;  %v465_v10 = vld [vmem:[#allocation5 + $0x70] sm:$0xff]   ;;  %v466_v11 = vld [vmem:[#allocation5 + $0x78] sm:$0xff]   ;;  %s519_s17 = scalar_lea.vmem %s348_s16, 128  ;;  %p524_p3 = scmp.lt.s32.totalorder %s348_s16, %s348_s16 }
  0x2a   :  { %404 = vmatprep.subr.bf16.mxu0 %v551_v0  ;;  %412 = vmatprep.subr.bf16.mxu1 %v551_v0  ;;  %v467_v12 = vld [vmem:[#allocation5 + $0x80] sm:$0xff]   ;;  %v468_v13 = vld [vmem:[#allocation5 + $0x88] sm:$0xff]   ;;  %v469_v14 = vld [vmem:[#allocation5 + $0x90] sm:$0xff]   ;;  %p520_p2 = scmp.ne.s32.totalorder %s348_s16, %s519_s17  ;;  %p525_p4 = scmp.lt.s32.totalorder %s519_s17, %s519_s17 }
  0x2b   :  { %v470_v15 = vld [vmem:[#allocation5 + $0x98] sm:$0xff]   ;;  %v471_v16 = vld [vmem:[#allocation5 + $0xa0] sm:$0xff]   ;;  %v472_v17 = vld [vmem:[#allocation5 + $0xa8] sm:$0xff]  }
  0x2c   :  { %v357_v18 = vld [vmem:[%s652_s2] ss:$0 sm:$0xff]  ;;  %v473_v26 = vld [vmem:[#allocation5 + $0xb0] sm:$0xff]   ;;  %v362_v28 = vld [vmem:[%s652_s2 + $0x1] ss:$0 sm:$0xff]  ;;  %p526_p5 = por %p525_p4, %p524_p3 }
  0x2d   :  { %405 = vmatpush3.bf16.msra.mxu0 %v458_v2  ;;  %413 = vmatpush3.bf16.msra.mxu1 %v460_v4  ;;  %v474_v27 = vld [vmem:[#allocation5 + $0xb8] sm:$0xff]  }
  0x2e   :  { %430 = vmatprep.subr.bf16.mxu0 %v551_v0  ;;  %414 = vmatprep.subr.bf16.mxu1 %v551_v0  ;;  %v372_v36 = vld [vmem:[%s652_s2 + $0x2] ss:$0 sm:$0xff]  ;;  %p527_p6 = pnand %p526_p5, %p520_p2 }
  0x30   :  { %407 = vmatmul.mubr.msk.bf16.vlgmr.msra.gmra.mrb[0].mxu0 %vm66_vm1, %v42_v5 }
  0x31   :  { %446 = vmatprep.mubr.msk.bf16.mxu0 %vm552_vm0, %v551_v0  ;;  %415 = vmatpush3.bf16.msra.mxu1 %v461_v6 }
  0x32   :  { %416 = vmatprep.subr.bf16.mxu1 %v551_v0  ;;  %431 = vmatpush3.bf16.msra.mxu0 %v467_v12 }
  0x33   :  { %432 = vmatprep.subr.bf16.mxu0 %v551_v0 }
  0x35   :  { %417 = vmatpush3.bf16.msra.mxu1 %v462_v7 }
  0x36   :  { %418 = vmatprep.subr.bf16.mxu1 %v551_v0  ;;  %433 = vmatpush3.bf16.msra.mxu0 %v468_v13 }
  0x37   :  { %434 = vmatprep.subr.bf16.mxu0 %v551_v0 }
  0x39   :  { %419 = vmatpush3.bf16.msra.mxu1 %v463_v8 }
  0x3a   :  { %420 = vmatprep.subr.bf16.mxu1 %v551_v0  ;;  %435 = vmatpush3.bf16.msra.mxu0 %v469_v14 }
  0x3b   :  { %436 = vmatprep.subr.bf16.mxu0 %v551_v0 }
  0x3d   :  { %421 = vmatpush3.bf16.msra.mxu1 %v464_v9 }
  0x3e   :  { %422 = vmatprep.subr.bf16.mxu1 %v551_v0  ;;  %437 = vmatpush3.bf16.msra.mxu0 %v470_v15 }
  0x3f   :  { %438 = vmatprep.subr.bf16.mxu0 %v551_v0 }
  0x41   :  { %423 = vmatpush3.bf16.msra.mxu1 %v465_v10 }
  0x42   :  { %424 = vmatprep.subr.bf16.mxu1 %v551_v0  ;;  %439 = vmatpush3.bf16.msra.mxu0 %v471_v16 }
  0x43   :  { %440 = vmatprep.subr.bf16.mxu0 %v551_v0 }
  0x45   :  { %425 = vmatpush3.bf16.msra.mxu1 %v466_v11 }
  0x46   :  { %441 = vmatpush3.bf16.msra.mxu0 %v472_v17 }
  0x47   :  { %442 = vmatprep.subr.bf16.mxu0 %v551_v0 }
  0x4a   :  { %443 = vmatpush3.bf16.msra.mxu0 %v473_v26 }
  0x4b   :  { %444 = vmatprep.subr.bf16.mxu0 %v551_v0 }
  0x4e   :  { %445 = vmatpush3.bf16.msra.mxu0 %v474_v27 }
 0x103   :  { %v104_v19 = vpop.f32.mrb[0].mxu0 }
 0x104   :  { %v105_v20 = vadd.f32 %v357_v18, %v104_v19  ;;  %v408_v21 = vpop.f32.mrb[1].mxu0 }
 0x105   :  { %v107_v22 = vpop.f32.mrb[2].mxu0 }
 0x106   :  { %v110_v23 = vmax.f32 %v105_v20, 0.0  ;;  %v409_v24 = vpop.f32.mrb[3].mxu0 }
 0x108   :  { %v111_v25 = vpack.c.bf16 %v110_v23, %v110_v23 }
 0x10a   :  { %427 = vmatmul.mubr.bf16.vlgmr.msra.gmra.mrb[0].mxu1 %v111_v25 }
 0x1dd   :  { %v219_v29 = vpop.f32.mrb[0].mxu1 }
 0x1de   :  { %v220_v30 = vadd.f32 %v362_v28, %v219_v29  ;;  %v428_v31 = vpop.f32.mrb[1].mxu1 }
 0x1df   :  { %v222_v32 = vpop.f32.mrb[2].mxu1 }
 0x1e0   :  { %v225_v33 = vmax.f32 %v220_v30, 0.0  ;;  %v429_v34 = vpop.f32.mrb[3].mxu1 }
 0x1e2   :  { %v226_v35 = vpack.c.bf16 %v225_v33, %v225_v33 }
 0x1e4   :  { %447 = vmatmul.mubr.bf16.vlgmr.msra.gmra.mrb[4].mxu0 %v226_v35 }
 0x2b7   :  { %v334_v37 = vpop.f32.mrb[4].mxu0 }
 0x2b8   :  { %v335_v38 = vadd.f32 %v372_v36, %v334_v37  ;;  %v448_v39 = vpop.f32.mrb[5].mxu0 }
 0x2b9   :  { %v337_v40 = vpop.f32.mrb[6].mxu0 }
 0x2ba   :  { %340 = vst [vmem:[#allocation7] sm:$0xff] %v335_v38  ;;  %v449_v41 = vpop.f32.mrb[7].mxu0 }
 0x2bb   :  { %530 = shalt.err (!%p527_p6)
}
 0x2bc   :  { %s531_s2 = scalar_lea.hbm %s653_s3, 128 }
 0x2bd   :  { %p532_p7 = scmp.ne.s32.totalorder %s653_s3, %s531_s2  ;;  %p535_p8 = scmp.lt.u32.totalorder %s531_s2, %s653_s3 }
 0x2bf   :  { %p537_p9 = pnand %p535_p8, %p532_p7 }
 0x2c1   :  { %540 = shalt.err (!%p537_p9)
}
 0x2c2   :  { %350 = dma.vmem_to_hbm [thread:$0]  %s348_s16, 128, %s653_s3, [#allocation4]  }
 0x2c3   :  { %545 = dma.done.wait [#allocation4], 128  }
 0x2c4   :  { %546 = vsyncadd [#allocation4], 4294967168 }
 0x2c5   :  { %354 = vsyncpa [#allocation3], 1 }
 0x2c6   :  { %355 = vsyncpa [#allocation6], 1 }
 0x2c7   :  { %356 = vsyncpa [#allocation4], 1 }

</bundles_post_ra>
